<compile_context>
chip_gen: v7x
topology: tpu7x:2x2x1
jax: 0.10.0
libtpu: 0.0.40
codegen_flags: <defaults>
</compile_context>

<pallas_src>
import math

import jax
import jax.numpy as jnp
from jax import lax
from jax.experimental import pallas as pl
from jax.experimental.pallas import tpu as pltpu

_INV_SQRT2 = float(1.0 / math.sqrt(2.0))


def _round_up(x, m):
    return ((x + m - 1) // m) * m


def _gelu_erf_f32(h):
    # Exact erf-based GELU (matches torch.nn.GELU() default), computed in f32.
    # TODO(synk): tanh-approx GELU would offload VALU->EUP but changes numerics.
    return 0.5 * h * (1.0 + lax.erf(h * jnp.float32(_INV_SQRT2)))


# ----------------------------- kernels ---------------------------------------


def _mlp_kernel_single(x_ref, w1_ref, b1_ref, w2_ref, b2_ref, o_ref):
    """Whole hidden dim in one step: no accumulator scratch, direct store."""
    cdt = w1_ref.dtype
    h = jnp.dot(x_ref[...].astype(cdt), w1_ref[...],
                preferred_element_type=jnp.float32) + b1_ref[...]
    h = _gelu_erf_f32(h)
    o_ref[...] = (jnp.dot(h.astype(w2_ref.dtype), w2_ref[...],
                          preferred_element_type=jnp.float32)
                  + b2_ref[...]).astype(o_ref.dtype)


def _mlp_kernel_tiled(x_ref, w1_ref, b1_ref, w2_ref, b2_ref, o_ref, acc_ref):
    """Hidden dim streamed as tiles; fc2 partial sums accumulated in f32 scratch."""
    cdt = w1_ref.dtype
    j = pl.program_id(1)

    @pl.when(j == 0)
    def _init():
        acc_ref[...] = jnp.zeros_like(acc_ref)

    h = jnp.dot(x_ref[...].astype(cdt), w1_ref[...],
                preferred_element_type=jnp.float32) + b1_ref[...]
    h = _gelu_erf_f32(h)
    # GELU is elementwise and fc2 sums over H, so per-slice accumulation is exact.
    acc_ref[...] += jnp.dot(h.astype(w2_ref.dtype), w2_ref[...],
                            preferred_element_type=jnp.float32)

    @pl.when(j == pl.num_programs(1) - 1)
    def _finalize():
        o_ref[...] = (acc_ref[...] + b2_ref[...]).astype(o_ref.dtype)


# ----------------------------- wrapper ---------------------------------------


def _vmem_budget_bytes():
    try:
        cap = int(pltpu.get_tpu_info().vmem_capacity_bytes)
    except Exception:
        cap = 64 * 1024 * 1024  # conservative fallback (v7x per-core VMEM)
    # Leave ~25% headroom for internal/compiler scratch and double buffering slack:
    # ~48 MiB on v7x (64 MiB), ~96 MiB on v5e/v6e (128 MiB).
    return (cap * 3) // 4


def _choose_hidden_tile(tm, C, H, O, x_isz, w_isz, out_isz, budget):
    """Return (th, vmem_need_bytes). th == H means weights stay VMEM-resident."""
    def need_for(th, resident):
        acc = 0 if resident else tm * O * 4          # f32 accumulator scratch
        return (2 * tm * C * x_isz                   # x tile (double-buffered)
                + 2 * (C * th + th * O) * w_isz      # weight tiles (2x conservative)
                + 2 * (th + O) * 4                   # bias tiles
                + 2 * tm * O * out_isz               # output tile (double-buffered)
                + tm * th * 4                        # f32 fc1 intermediate
                + acc)

    resident_need = need_for(H, resident=True)
    if resident_need <= budget:
        return H, resident_need

    # Must stream the hidden dim: th has to be a multiple of 128 AND divide H exactly
    # (a partial hidden tile would accumulate garbage into fc2).
    for th in (1024, 768, 512, 384, 256, 128):
        if th < H and H % th == 0 and th % 128 == 0:
            need = need_for(th, resident=False)
            if need <= budget:
                return th, need
    return H, resident_need  # correctness over budget


def prepare_mlp_params(w1, b1, w2, b2, compute_dtype=jnp.bfloat16):
    """One-time parameter prep (do this OUTSIDE the per-call serving path):
    weights cast to the MXU compute dtype, biases kept f32 as (1, H)/(1, O)."""
    return (w1.astype(compute_dtype), b1.reshape(1, -1).astype(jnp.float32),
            w2.astype(compute_dtype), b2.reshape(1, -1).astype(jnp.float32))


def mlp_pallas(x, w1, b1, w2, b2, *, tm=256, compute_dtype=jnp.bfloat16):
    """x: (B, N, C). w1: (C, H), b1: (H,)|(1,H), w2: (H, O), b2: (O,)|(1,O).

    Returns (B, N, O) in x.dtype. Matmul operands use `compute_dtype` (default bf16);
    accumulation, biases and the erf-GELU are f32.
    """
    B, N, C = x.shape
    H = w1.shape[1]
    O = w2.shape[1]
    M = B * N

    out_dtype = x.dtype
    cdt = jnp.dtype(compute_dtype)

    # Only cast if mismatched (prefer prepare_mlp_params for a one-time cast).
    w1c = w1 if w1.dtype == cdt else w1.astype(cdt)
    w2c = w2 if w2.dtype == cdt else w2.astype(cdt)
    b1_2d = b1.reshape(1, H).astype(jnp.float32)
    b2_2d = b2.reshape(1, O).astype(jnp.float32)

    x_isz = jnp.dtype(x.dtype).itemsize
    w_isz = cdt.itemsize
    out_isz = jnp.dtype(out_dtype).itemsize

    # Row-tile multiple: 8 for f32, 16 for bf16, 32 for 8-bit (packed sublanes).
    rowmult = 8
    for dt in (x.dtype, out_dtype, cdt):
        rowmult = max(rowmult, 32 // max(1, jnp.dtype(dt).itemsize))

    # Row tile: big for MXU utilisation, but guarantee >=2 tiles on the parallel axis
    # (v7x megacore) whenever M allows it.
    tm_sel = max(rowmult, min(_round_up(tm, rowmult), _round_up(M, rowmult)))
    if pl.cdiv(M, tm_sel) < 2 and M > rowmult:
        tm_sel = max(rowmult, _round_up(pl.cdiv(M, 2), rowmult))

    budget = _vmem_budget_bytes()
    th, vmem_need = _choose_hidden_tile(tm_sel, C, H, O, x_isz, w_isz, out_isz, budget)

    n_row_tiles = pl.cdiv(M, tm_sel)
    x2d = x.reshape(M, C)  # no pad: Pallas clips the partial last row tile

    weight_bytes = (C * H + H * O) * w_isz
    if th != H:
        weight_bytes *= n_row_tiles  # streamed weights are re-fetched per row tile
    cost = pl.CostEstimate(
        flops=2 * M * (C * H + H * O),
        transcendentals=M * H,
        bytes_accessed=M * C * x_isz + weight_bytes + (H + O) * 4 + M * O * out_isz,
    )

    vmem_limit = int(min(max(vmem_need * 5 // 4, 32 * 1024 * 1024), budget))

    if th == H:
        kernel = _mlp_kernel_single
        grid = (n_row_tiles,)
        in_specs = [
            pl.BlockSpec((tm_sel, C), lambda i: (i, 0)),   # x row tile
            pl.BlockSpec((C, H), lambda i: (0, 0)),        # W1 resident
            pl.BlockSpec((1, H), lambda i: (0, 0)),        # b1
            pl.BlockSpec((H, O), lambda i: (0, 0)),        # W2 resident
            pl.BlockSpec((1, O), lambda i: (0, 0)),        # b2
        ]
        out_specs = pl.BlockSpec((tm_sel, O), lambda i: (i, 0))
        scratch_shapes = []
        dim_sem = ("parallel",)
    else:
        kernel = _mlp_kernel_tiled
        grid = (n_row_tiles, H // th)
        in_specs = [
            pl.BlockSpec((tm_sel, C), lambda i, j: (i, 0)),  # x row tile
            pl.BlockSpec((C, th), lambda i, j: (0, j)),      # W1 column tile
            pl.BlockSpec((1, th), lambda i, j: (0, j)),      # b1 slice
            pl.BlockSpec((th, O), lambda i, j: (j, 0)),      # W2 row tile
            pl.BlockSpec((1, O), lambda i, j: (0, 0)),       # b2
        ]
        out_specs = pl.BlockSpec((tm_sel, O), lambda i, j: (i, 0))
        scratch_shapes = [pltpu.VMEM((tm_sel, O), jnp.float32)]
        dim_sem = ("parallel", "arbitrary")

    out2d = pl.pallas_call(
        kernel,
        out_shape=jax.ShapeDtypeStruct((M, O), out_dtype),
        grid_spec=pltpu.PrefetchScalarGridSpec(
            num_scalar_prefetch=0,
            grid=grid,
            in_specs=in_specs,
            out_specs=out_specs,
            scratch_shapes=scratch_shapes,
        ),
        compiler_params=pltpu.CompilerParams(
            dimension_semantics=dim_sem,
            vmem_limit_bytes=vmem_limit,
        ),
        cost_estimate=cost,
    )(x2d, w1c, b1_2d, w2c, b2_2d)

    return out2d.reshape(B, N, O)


# ----------------------------- reference & demo ------------------------------


def init_linear(key, fan_in, fan_out, dtype=jnp.float32):
    """Deterministic init mimicking torch.nn.Linear defaults (uniform +/- 1/sqrt(fan_in))."""
    kw, kb = jax.random.split(key)
    bound = 1.0 / math.sqrt(fan_in)
    # stored as (in, out) so the kernel does x @ W (equivalent to torch's x @ W.T)
    w = jax.random.uniform(kw, (fan_in, fan_out), dtype, minval=-bound, maxval=bound)
    b = jax.random.uniform(kb, (fan_out,), dtype, minval=-bound, maxval=bound)
    return w, b


def _reference(x, w1, b1, w2, b2):
    B, N, C = x.shape
    h = x.reshape(-1, C) @ w1 + b1
    h = 0.5 * h * (1.0 + lax.erf(h * jnp.float32(_INV_SQRT2)))
    return (h @ w2 + b2).reshape(B, N, w2.shape[1])


if __name__ == "__main__":
    key = jax.random.PRNGKey(0)
    k_x, k_fc1, k_fc2 = jax.random.split(key, 3)

    # Small, lane-dense demo shapes (C, H, O multiples of 128 keep stores unmasked).
    B, N = 2, 64                 # batch, tokens -> M = 128 rows
    in_features = 128
    hidden_features = 256
    out_features = 128           # out_features defaults to in_features

    x = jax.random.normal(k_x, (B, N, in_features), jnp.float32)
    w1, b1 = init_linear(k_fc1, in_features, hidden_features)
    w2, b2 = init_linear(k_fc2, hidden_features, out_features)

    ref = _reference(x, w1, b1, w2, b2)

    # One-time parameter prep: bf16 weights, f32 (1, H)/(1, O) biases.
    w1_c, b1_c, w2_c, b2_c = prepare_mlp_params(w1, b1, w2, b2)

    # 1) Default bf16 MXU path (f32 accumulate / bias / GELU). bf16 rounding tolerance.
    out = jax.block_until_ready(mlp_pallas(x, w1_c, b1_c, w2_c, b2_c))
    assert jnp.allclose(out, ref, atol=5e-2, rtol=5e-2), "bf16 mismatch vs reference"

    # 2) f32 operand path: exact parity with torch's f32 Mlp (erf GELU, f32 matmuls).
    out_f32 = jax.block_until_ready(
        mlp_pallas(x, w1, b1, w2, b2, compute_dtype=jnp.float32))
    assert jnp.allclose(out_f32, ref, atol=1e-4, rtol=1e-4), "f32 mismatch vs reference"

    # 3) Ragged token count (M not divisible by tm -> partial last tile, masked store).
    x_odd = x[:, :37, :]
    out_odd = jax.block_until_ready(mlp_pallas(x_odd, w1_c, b1_c, w2_c, b2_c))
    assert jnp.allclose(out_odd, ref[:, :37, :], atol=5e-2, rtol=5e-2), \
        "ragged-tail mismatch vs reference"

    print("KERNEL_OK")
</pallas_src>

<mosaic_0001>
module attributes {stable_mosaic.version = 11 : i64} {
  func.func @_mlp_kernel_single(%arg0: i32, %arg1: memref<64x128xf32, #tpu.memory_space<vmem>>, %arg2: memref<128x256xbf16, #tpu.memory_space<vmem>>, %arg3: memref<1x256xf32, #tpu.memory_space<vmem>>, %arg4: memref<256x128xbf16, #tpu.memory_space<vmem>>, %arg5: memref<1x128xf32, #tpu.memory_space<vmem>>, %arg6: memref<64x128xf32, #tpu.memory_space<vmem>>) attributes {dimension_semantics = [#tpu.dimension_semantics<parallel>], iteration_bounds = array<i64: 2>, scalar_prefetch = 0 : i64, scratch_operands = 0 : i64, tpu.core_type = #tpu.core_type<tc>, window_params = [{transform_indices = @transform_0, window_bounds = array<i64: 64, 128>}, {pipeline_mode = #tpu.pipeline_mode<synchronous>, transform_indices = @transform_1, window_bounds = array<i64: 128, 256>}, {pipeline_mode = #tpu.pipeline_mode<synchronous>, transform_indices = @transform_2, window_bounds = array<i64: 1, 256>}, {pipeline_mode = #tpu.pipeline_mode<synchronous>, transform_indices = @transform_3, window_bounds = array<i64: 256, 128>}, {pipeline_mode = #tpu.pipeline_mode<synchronous>, transform_indices = @transform_4, window_bounds = array<i64: 1, 128>}, {transform_indices = @transform_5, window_bounds = array<i64: 64, 128>}]} {
    %c0 = arith.constant 0 : index
    %c0_0 = arith.constant 0 : index
    %0 = vector.load %arg1[%c0, %c0_0] : memref<64x128xf32, #tpu.memory_space<vmem>>, vector<64x128xf32>
    %1 = arith.truncf %0 : vector<64x128xf32> to vector<64x128xbf16>
    %c0_1 = arith.constant 0 : index
    %c0_2 = arith.constant 0 : index
    %2 = vector.load %arg2[%c0_1, %c0_2] : memref<128x256xbf16, #tpu.memory_space<vmem>>, vector<128x256xbf16>
    %cst = arith.constant dense<0.000000e+00> : vector<64x256xf32>
    %3 = tpu.matmul %1, %2, %cst {dimension_numbers = #tpu.dot_dimension_numbers<[1], [0], [0], [1], [0, 0, 1, 1], [], []>} : vector<64x128xbf16>, vector<128x256xbf16>, vector<64x256xf32> -> vector<64x256xf32>
    %c0_3 = arith.constant 0 : index
    %c0_4 = arith.constant 0 : index
    %4 = vector.load %arg3[%c0_3, %c0_4] : memref<1x256xf32, #tpu.memory_space<vmem>>, vector<1x256xf32>
    %5 = vector.broadcast %4 : vector<1x256xf32> to vector<64x256xf32>
    %6 = arith.addf %3, %5 : vector<64x256xf32>
    %cst_5 = arith.constant 5.000000e-01 : f32
    %7 = vector.broadcast %cst_5 : f32 to vector<64x256xf32>
    %8 = arith.mulf %7, %6 : vector<64x256xf32>
    %cst_6 = arith.constant 0.707106769 : f32
    %9 = vector.broadcast %cst_6 : f32 to vector<64x256xf32>
    %10 = arith.mulf %6, %9 : vector<64x256xf32>
    %11 = math.erf %10 : vector<64x256xf32>
    %cst_7 = arith.constant 1.000000e+00 : f32
    %12 = vector.broadcast %cst_7 : f32 to vector<64x256xf32>
    %13 = arith.addf %12, %11 : vector<64x256xf32>
    %14 = arith.mulf %8, %13 : vector<64x256xf32>
    %15 = arith.truncf %14 : vector<64x256xf32> to vector<64x256xbf16>
    %c0_8 = arith.constant 0 : index
    %c0_9 = arith.constant 0 : index
    %16 = vector.load %arg4[%c0_8, %c0_9] : memref<256x128xbf16, #tpu.memory_space<vmem>>, vector<256x128xbf16>
    %cst_10 = arith.constant dense<0.000000e+00> : vector<64x128xf32>
    %17 = tpu.matmul %15, %16, %cst_10 {dimension_numbers = #tpu.dot_dimension_numbers<[1], [0], [0], [1], [0, 0, 1, 1], [], []>} : vector<64x256xbf16>, vector<256x128xbf16>, vector<64x128xf32> -> vector<64x128xf32>
    %c0_11 = arith.constant 0 : index
    %c0_12 = arith.constant 0 : index
    %18 = vector.load %arg5[%c0_11, %c0_12] : memref<1x128xf32, #tpu.memory_space<vmem>>, vector<1x128xf32>
    %19 = vector.broadcast %18 : vector<1x128xf32> to vector<64x128xf32>
    %20 = arith.addf %17, %19 : vector<64x128xf32>
    %c0_13 = arith.constant 0 : index
    %c0_14 = arith.constant 0 : index
    %21 = vector.load %arg6[%c0_13, %c0_14] : memref<64x128xf32, #tpu.memory_space<vmem>>, vector<64x128xf32>
    tpu.vector_store %arg6[%c0_13, %c0_14], %20 {strides = array<i32>} : memref<64x128xf32, #tpu.memory_space<vmem>>, vector<64x128xf32>,
    return
  }
  func.func @transform_0(%arg0: i32) -> (i32, i32) {
    %c0_i32 = arith.constant 0 : i32
    %c0_i32_0 = arith.constant 0 : i32
    return %arg0, %c0_i32 : i32, i32
  }
  func.func @transform_1(%arg0: i32) -> (i32, i32) {
    %c0_i32 = arith.constant 0 : i32
    %c0_i32_0 = arith.constant 0 : i32
    %c0_i32_1 = arith.constant 0 : i32
    return %c0_i32, %c0_i32_0 : i32, i32
  }
  func.func @transform_2(%arg0: i32) -> (i32, i32) {
    %c0_i32 = arith.constant 0 : i32
    %c0_i32_0 = arith.constant 0 : i32
    %c0_i32_1 = arith.constant 0 : i32
    return %c0_i32, %c0_i32_0 : i32, i32
  }
  func.func @transform_3(%arg0: i32) -> (i32, i32) {
    %c0_i32 = arith.constant 0 : i32
    %c0_i32_0 = arith.constant 0 : i32
    %c0_i32_1 = arith.constant 0 : i32
    return %c0_i32, %c0_i32_0 : i32, i32
  }
  func.func @transform_4(%arg0: i32) -> (i32, i32) {
    %c0_i32 = arith.constant 0 : i32
    %c0_i32_0 = arith.constant 0 : i32
    %c0_i32_1 = arith.constant 0 : i32
    return %c0_i32, %c0_i32_0 : i32, i32
  }
  func.func @transform_5(%arg0: i32) -> (i32, i32) {
    %c0_i32 = arith.constant 0 : i32
    %c0_i32_0 = arith.constant 0 : i32
    return %arg0, %c0_i32 : i32, i32
  }
}

</mosaic_0001>

<bundles_post_ra>
// kernel: tpu_custom_call.1
= control target key start
LH: loop header
LB: loop body
LE: loop exit
PB: predicated region body
PF: predicated region fallthrough
CT: control target
= control target key end

     0   :  { %10 = vsyncpa [#allocation3], 0  ;;  %s1607_s0 = inlined_call_operand.hbm [shape: f32[128,128], index: 0, kind: input, shape index: {}]   ;;  %s1608_s1 = inlined_call_operand.hbm [shape: bf16[128,256], index: 1, kind: input, shape index: {}]   ;;  %s1609_s2 = inlined_call_operand.vmem [shape: f32[1,256], index: 2, kind: input, shape index: {}]   ;;  %s1610_s3 = inlined_call_operand.hbm [shape: bf16[256,128], index: 3, kind: input, shape index: {}]   ;;  %s1611_s4 = inlined_call_operand.vmem [shape: f32[1,128], index: 4, kind: input, shape index: {}]   ;;  %s1612_s5 = inlined_call_operand.hbm [shape: f32[128,128], index: 5, kind: output, shape index: {}]  }
   0x1   :  { %12 = vsyncpa [#allocation3 + $0x1], 0 }
   0x2   :  { %13 = vsyncpa [#allocation6], 0 }
   0x3   :  { %14 = vsyncpa [#allocation4], 0 }
   0x4   :  { %16 = vsyncpa [#allocation4 + $0x1], 0  ;;  %s1308_s18 = smov 0   ;;  %s1310_s19 = smov 0  }
   0x5   :  { %s1312_s20 = smov 0   ;;  %s1314_s21 = smov 0  }
   0x6 LB: > { %s1329_s22 = sadd.s32 4294967295, %s1265_s21   ;;  %s870_s23 = sadd.s32 4294967294, %s1265_s21   ;;  %s1265_s21 = sphi %s1314_s21, %s1632_s21   ;;  %s1261_s20 = sphi %s1312_s20, %s1631_s20   ;;  %s1257_s19 = sphi %s1310_s19, %s1630_s19   ;;  %s1253_s18 = sphi %s1308_s18, %s1629_s18  }
   0x7   : > { %p42_p0 = scmp.ne.s32.totalorder %s1257_s19, %s1253_s18  ;;  %p1613_p1 = scmp.eq.s32.totalorder %s1329_s22, 0 }
   0x8   : > { %p156_p3 = scmp.eq.s32.totalorder %s870_s23, 1  ;;  %p871_p5 = scmp.ge.s32.totalorder %s1265_s21, 1 }
   0x9   : > { %p1338_p4 = por %p1613_p1, %p42_p0  ;;  %p163_p7 = scmp.lt.s32.totalorder %s1265_s21, 3 }
   0xa   : > { %p1343_p6 = por %p156_p3, %p42_p0  ;;  %s1267_s27 = smov [#allocation5]  }
   0xb   : > { %s1616_s24 = scalar_select %p1338_p4, 1, 0 }
   0xc   : > { %s1617_s25 = scalar_select %p1343_p6, 1, 0 }
   0xd   : > { %p1348_p8 = pnand %p871_p5, %p163_p7  ;;  %s175_s28 = sshll.u32 %s1267_s27, 4  ;;  %s1352_s28 = int_to_ptr.vmem [resolvable:$true] %s175_s28 }
   0xe   : > { %s1268_s30 = smov [#allocation7]   ;;  %s1109_s9 = scalar_lea.hbm %s1608_s1, 2048 }
   0xf   : > { %p975_p9 = pneg %p1348_p8  ;;  %s191_s6 = sshll.u32 %s1268_s30, 4  ;;  %s1363_s6 = int_to_ptr.vmem [resolvable:$true] %s191_s6 }
  0x10   : > { %p1110_p12 = scmp.ne.s32.totalorder %s1608_s1, %s1109_s9  ;;  %p1116_p5 = scmp.lt.u32.totalorder %s1109_s9, %s1608_s1 }
  0x11   : > { %p1359_p11 = pnand %p975_p9, %p1613_p1 }
  0x13   : > { %p1111_p13 = pneg %p1359_p11 }
  0x15   : > { %p1112_p0 = pnand %p1111_p13, %p1110_p12 }
  0x17   : > { %p1113_p3 = pneg %p1112_p0 }
  0x19   : > { %p1118_p7 = pnand %p1116_p5, %p1113_p3 }
  0x1b   : > { %1121 = shalt.err (!%p1118_p7)
}
  0x1c   : > { %s1122_s14 = scalar_lea.vmem %s1352_s28, 2048  ;;  %p1130_p2 = scmp.lt.s32.totalorder %s1352_s28, %s1352_s28 }
  0x1d   : > { %p1123_p9 = scmp.ne.s32.totalorder %s1352_s28, %s1122_s14  ;;  %p1131_p12 = scmp.lt.s32.totalorder %s1122_s14, %s1122_s14 }
  0x1f   : > { %p1125_p10 = pnand %p1123_p9, %p1111_p13  ;;  %p1132_p0 = por %p1131_p12, %p1130_p2 }
  0x21   : > { %p1126_p1 = pneg %p1125_p10 }
  0x23   : > { %p1133_p6 = pnand %p1132_p0, %p1126_p1 }
  0x25   : > { %1136 = shalt.err (!%p1133_p6)
}
  0x26   : > { %s1269_s15 = smov 128   ;;  %s1270_s16 = smov 8  }
  0x27   : > { %978 = dma.hbm_to_vmem [thread:$0]  (!%p1359_p11), %s1608_s1, 2048, %s1352_s28, [#allocation6], %s1269_s15, %s1269_s15, %s1270_s16  }
  0x28   : > { %s1137_s7 = scalar_lea.hbm %s1610_s3, 2048 }
  0x29   : > { %p1138_p1 = scmp.ne.s32.totalorder %s1610_s3, %s1137_s7  ;;  %p1144_p10 = scmp.lt.u32.totalorder %s1137_s7, %s1610_s3 }
  0x2b   : > { %p1140_p2 = pnand %p1138_p1, %p1111_p13 }
  0x2d   : > { %p1141_p6 = pneg %p1140_p2 }
  0x2f   : > { %p1146_p3 = pnand %p1144_p10, %p1141_p6 }
  0x31   : > { %1149 = shalt.err (!%p1146_p3)
}
  0x32   : > { %s1150_s28 = scalar_lea.vmem %s1363_s6, 2048  ;;  %p1158_p12 = scmp.lt.s32.totalorder %s1363_s6, %s1363_s6 }
  0x33   : > { %p1151_p5 = scmp.ne.s32.totalorder %s1363_s6, %s1150_s28  ;;  %p1159_p0 = scmp.lt.s32.totalorder %s1150_s28, %s1150_s28 }
  0x35   : > { %p1153_p7 = pnand %p1151_p5, %p1111_p13  ;;  %p1160_p1 = por %p1159_p0, %p1158_p12 }
  0x37   : > { %p1154_p9 = pneg %p1153_p7 }
  0x39   : > { %p1161_p2 = pnand %p1160_p1, %p1154_p9 }
  0x3b   : > { %1164 = shalt.err (!%p1161_p2)
}
  0x3c   : > { %s1271_s12 = smov 64   ;;  %s1272_s13 = smov 4  }
  0x3d   : > { %981 = dma.hbm_to_vmem [thread:$0]  (!%p1359_p11), %s1610_s3, 2048, %s1363_s6, [#allocation6], %s1271_s12, %s1271_s12, %s1272_s13  }
  0x3e   : > { %s1421_s23 = sadd.s32 1, %s1265_s21   ;;  %s29_s30 = sadd.s32 1, %s1261_s20 }
  0x3f   : > { %s26_s27 = ssub.s32 %s1265_s21, %s1421_s23  ;;  %p36_p6 = scmp.ne.s32.totalorder %s1261_s20, %s1257_s19 }
  0x40   : > { %p27_p13 = scmp.eq.s32.totalorder %s26_s27, 0  ;;  %p37_p10 = scmp.eq.s32.totalorder %s1265_s21, 0 }
  0x41   : > { %p1620_p5 = scmp.eq.s32.totalorder %s1329_s22, 1  ;;  %p992_p9 = scmp.lt.s32.totalorder %s1265_s21, 2 }
  0x42   : > { %s1430_s7 = scalar_select %p27_p13, %s1261_s20, %s29_s30  }
  0x43   : > { %p38_p3 = por %p37_p10, %p36_p6  ;;  %p1434_p7 = por %p1620_p5, %p36_p6 }
  0x44   : > { %s208_s29 = sand.u32 1, %s1261_s20   ;;  %s921_s6 = sshll.u32 %s1265_s21, 10 }
  0x45   : > { %s1621_s8 = scalar_select %p1434_p7, 1, 0 }
  0x46   : > { %s875_s9 = sshll.u32 %s208_s29, 6  ;;  %s1444_s28 = scalar_lea.hbm %s1607_s0, %s921_s6 }
  0x47   : > { %s212_s12 = scalar_lea.vmem [#allocation2], %s875_s9  ;;  %p1448_p11 = pnand %p992_p9, %p38_p3 }
  0x48   : > { %s219_s13 = sshll.u32 %s212_s12, 4  ;;  %s1452_s17 = scalar_lea.sflag [#allocation3], %s208_s29  ;;  %s1446_s13 = int_to_ptr.vmem [resolvable:$true] %s219_s13 }
  0x49   : > { %s1165_s27 = scalar_lea.hbm %s1444_s28, 1024  ;;  %p1167_p0 = pneg %p1448_p11 }
  0x4a   : > { %p1166_p12 = scmp.ne.s32.totalorder %s1444_s28, %s1165_s27  ;;  %s1170_s6 = scalar_lea.hbm %s1607_s0, 2048 }
  0x4b   : > { %p1171_p13 = scmp.lt.u32.totalorder %s1444_s28, %s1607_s0  ;;  %p1172_p6 = scmp.lt.u32.totalorder %s1170_s6, %s1165_s27 }
  0x4c   : > { %p1168_p1 = pnand %p1167_p0, %p1166_p12  ;;  %p1174_p3 = scmp.lt.u32.totalorder %s1165_s27, %s1444_s28 }
  0x4d   : > { %p1173_p10 = por %p1172_p6, %p1171_p13 }
  0x4e   : > { %p1169_p2 = pneg %p1168_p1 }
  0x4f   : > { %p1175_p5 = por %p1174_p3, %p1173_p10 }
  0x51   : > { %p1176_p9 = pnand %p1175_p5, %p1169_p2 }
  0x53   : > { %1179 = shalt.err (!%p1176_p9)
}
  0x54   : > { %s1180_s29 = scalar_lea.vmem %s1446_s13, 1024  ;;  %s1273_s12 = smov [#allocation2]  }
  0x55   : > { %p1181_p12 = scmp.ne.s32.totalorder %s1446_s13, %s1180_s29  ;;  %s1185_s30 = sshll.u32 %s1273_s12, 4  ;;  %s1186_s30 = int_to_ptr.vmem [resolvable:$false] %s1185_s30 }
  0x56   : > { %s1187_s9 = scalar_lea.vmem %s1186_s30, 2048  ;;  %p1188_p4 = scmp.lt.s32.totalorder %s1446_s13, %s1186_s30 }
  0x57   : > { %p1183_p1 = pnand %p1181_p12, %p1167_p0  ;;  %p1189_p13 = scmp.lt.s32.totalorder %s1187_s9, %s1180_s29 }
  0x59   : > { %p1184_p7 = pneg %p1183_p1  ;;  %p1190_p6 = por %p1189_p13, %p1188_p4 }
  0x5b   : > { %p1191_p10 = pnand %p1190_p6, %p1184_p7 }
  0x5d   : > { %1194 = shalt.err (!%p1191_p10)
}
  0x5e   : > { %985 = dma.hbm_to_vmem [thread:$0]  (!%p1448_p11), %s1444_s28, 1024, %s1446_s13, %s1452_s17, %s1269_s15, %s1269_s15, %s1270_s16  }
  0x5f   : > { %231 = sbr.rel (%p1348_p8) target bundleno = 634 (0x27a), region = 40  ;;  %s1486_s27 = sand.u32 (!%p1348_p8), 1, %s1257_s19  }
  0x60   : > { %s879_s6 = sshll.u32 (!%p1348_p8), %s1486_s27, 6  ;;  %s234_s10 = scalar_lea.sflag (!%p1348_p8), [#allocation3], %s1486_s27 }
  0x61   : > { %s1492_s14 = scalar_lea.vmem (!%p1348_p8), [#allocation2], %s879_s6  ;;  %p1623_p4 = scmp.ne.s32.totalorder (!%p1348_p8), %s1616_s24, 0 }
  0x66   : > { %1240 = dma.done.wait (%p1623_p4), %s234_s10, 1024  }
  0x67   : > { %1242 = vsyncadd (%p1623_p4), %s234_s10, 4294966272  ;;  %p1624_p7 = scmp.eq.s32.totalorder %s1329_s22, 0 }
  0x69   : > { %1244 = dma.done.wait (%p1624_p7), [#allocation6], 4096   ;;  %p1625_p8 = pmov %p1624_p7 }
  0x6a   : > { %v1274_v0 = vmov 0   ;;  %v1037_v1 = vld [vmem:[#allocation5 + $0x4] ss:$8 sps:$4 sm:$0xff]   ;;  %v1039_v2 = vld [vmem:[#allocation5] ss:$8 sps:$4 sm:$0xff]   ;;  %v277_v24 = vld [vmem:[%s1492_s14 + $0x10] sm:$0xff]  ;;  %v305_v45 = vlaneseq }
  0x6b   : > { %1246 = vsyncadd (%p1625_p8), [#allocation6], 4294963200  ;;  %427 = vmatprep.mubr.bf16.mxu0 %v1274_v0  ;;  %395 = vmatprep.subr.bf16.mxu0 %v1037_v1  ;;  %v1040_v3 = vld [vmem:[#allocation5 + $0x14] ss:$8 sps:$4 sm:$0xff]   ;;  %v1042_v4 = vld [vmem:[#allocation5 + $0x10] ss:$8 sps:$4 sm:$0xff]  }
  0x6c   : > { %396 = vmatpush1.bf16.msra.mxu0 %v1039_v2  ;;  %v1043_v5 = vld [vmem:[#allocation5 + $0x24] ss:$8 sps:$4 sm:$0xff]   ;;  %v1045_v6 = vld [vmem:[#allocation5 + $0x20] ss:$8 sps:$4 sm:$0xff]   ;;  %v1046_v7 = vld [vmem:[#allocation5 + $0x34] ss:$8 sps:$4 sm:$0xff]  }
  0x6d   : > { %397 = vmatprep.subr.bf16.mxu0 %v1040_v3  ;;  %v1048_v8 = vld [vmem:[#allocation5 + $0x30] ss:$8 sps:$4 sm:$0xff]   ;;  %v1049_v9 = vld [vmem:[#allocation5 + $0x44] ss:$8 sps:$4 sm:$0xff]   ;;  %v1051_v10 = vld [vmem:[#allocation5 + $0x40] ss:$8 sps:$4 sm:$0xff]  }
  0x6e   : > { %v1052_v11 = vld [vmem:[#allocation5 + $0x54] ss:$8 sps:$4 sm:$0xff]   ;;  %v1061_v12 = vld [vmem:[#allocation7 + $0x40] sm:$0xff]   ;;  %v1063_v14 = vld [vmem:[#allocation7 + $0x48] sm:$0xff]   ;;  %v306_v46 = vshrl.u32 %v305_v45, 7  ;;  %s1546_s28 = scalar_lea.vmem [#allocation8], %s879_s6 }
  0x6f   : > { %v1062_v13 = vld [vmem:[#allocation7] sm:$0xff]   ;;  %923 = vmatprep.subr.bf16.mxu1 %v1061_v12  ;;  %v1054_v15 = vld [vmem:[#allocation5 + $0x50] ss:$8 sps:$4 sm:$0xff]   ;;  %v1064_v16 = vld [vmem:[#allocation7 + $0x8] sm:$0xff]   ;;  %s778_s13 = sshll.u32 %s1546_s28, 4  ;;  %s922_s17 = sshll.u32 %s1329_s22, 10  ;;  %s1556_s13 = int_to_ptr.vmem [resolvable:$true] %s778_s13 }
  0x70   : > { %398 = vmatpush1.bf16.msra.mxu0 %v1042_v4  ;;  %924 = vmatpush3.bf16.msra.mxu1 %v1062_v13  ;;  %v1055_v17 = vld [vmem:[#allocation5 + $0x64] ss:$8 sps:$4 sm:$0xff]   ;;  %v1057_v18 = vld [vmem:[#allocation5 + $0x60] ss:$8 sps:$4 sm:$0xff]   ;;  %v1058_v19 = vld [vmem:[#allocation5 + $0x74] ss:$8 sps:$4 sm:$0xff]   ;;  %s1561_s12 = scalar_lea.hbm %s1612_s5, %s922_s17 }
  0x71   : > { %399 = vmatprep.subr.bf16.mxu0 %v1043_v5  ;;  %925 = vmatprep.subr.bf16.mxu1 %v1063_v14  ;;  %v1060_v20 = vld [vmem:[#allocation5 + $0x70] ss:$8 sps:$4 sm:$0xff]   ;;  %v275_v21 = vld [vmem:[%s1492_s14] sm:$0xff]  ;;  %v276_v22 = vld [vmem:[%s1492_s14 + $0x8] sm:$0xff]  ;;  %v307_v47 = vsub.s32 0, %v306_v46  ;;  %v311_v49 = vsub.s32 1, %v306_v46 }
  0x72   : > { %v283_v23 = vpack.c.bf16 %v276_v22, %v275_v21  ;;  %v278_v25 = vld [vmem:[%s1492_s14 + $0x18] sm:$0xff]  ;;  %v279_v27 = vld [vmem:[%s1492_s14 + $0x20] sm:$0xff]  ;;  %v280_v28 = vld [vmem:[%s1492_s14 + $0x28] sm:$0xff]  ;;  %s765_s30 = scalar_lea.sflag [#allocation4], %s1486_s27  ;;  %s1195_s9 = scalar_lea.vmem %s1556_s13, 1024 }
  0x73   : > { %v284_v26 = vpack.c.bf16 %v278_v25, %v277_v24  ;;  %v285_v29 = vpack.c.bf16 %v280_v28, %v279_v27  ;;  %v281_v30 = vld [vmem:[%s1492_s14 + $0x30] sm:$0xff]  ;;  %v282_v31 = vld [vmem:[%s1492_s14 + $0x38] sm:$0xff]  ;;  %v1069_v37 = vld [vmem:[#allocation7 + $0x60] sm:$0xff]   ;;  %p1196_p11 = scmp.ne.s32.totalorder %s1556_s13, %s1195_s9  ;;  %p1626_p0 = scmp.ne.s32.totalorder %s1621_s8, 0 }
  0x74   : > { %400 = vmatpush1.bf16.msra.mxu0 %v1045_v6  ;;  %926 = vmatpush3.bf16.msra.mxu1 %v1064_v16  ;;  %v286_v32 = vpack.c.bf16 %v282_v31, %v281_v30  ;;  %v1065_v33 = vld [vmem:[#allocation7 + $0x50] sm:$0xff]   ;;  %v1067_v35 = vld [vmem:[#allocation7 + $0x58] sm:$0xff]   ;;  %v1070_v38 = vld [vmem:[#allocation7 + $0x20] sm:$0xff]   ;;  %s1275_s22 = smov [#allocation8]  }
  0x75   : > { %401 = vmatprep.subr.bf16.mxu0 %v1046_v7  ;;  %v1066_v34 = vld [vmem:[#allocation7 + $0x10] sm:$0xff]   ;;  %927 = vmatprep.subr.bf16.mxu1 %v1065_v33  ;;  %v1068_v36 = vld [vmem:[#allocation7 + $0x18] sm:$0xff]   ;;  %v1071_v39 = vld [vmem:[#allocation7 + $0x68] sm:$0xff]   ;;  %p1197_p2 = pnand %p1196_p11, %p1626_p0  ;;  %s1199_s6 = sshll.u32 %s1275_s22, 4  ;;  %s1200_s6 = int_to_ptr.vmem [resolvable:$false] %s1199_s6 }
  0x76   : > { %v1072_v40 = vld [vmem:[#allocation7 + $0x28] sm:$0xff]   ;;  %v1073_v41 = vld [vmem:[#allocation7 + $0x70] sm:$0xff]   ;;  %v1075_v43 = vld [vmem:[#allocation7 + $0x78] sm:$0xff]   ;;  %s1201_s10 = scalar_lea.vmem %s1200_s6, 2048  ;;  %p1202_p5 = scmp.lt.s32.totalorder %s1556_s13, %s1200_s6 }
  0x77   : > { %v1074_v42 = vld [vmem:[#allocation7 + $0x30] sm:$0xff]   ;;  %v1076_v44 = vld [vmem:[#allocation7 + $0x38] sm:$0xff]   ;;  %v303_v48 = vld [vmem:[%s1609_s2] sm:$0x3]  ;;  %p1198_p3 = pneg %p1197_p2  ;;  %p1203_p9 = scmp.lt.s32.totalorder %s1201_s10, %s1195_s9 }
  0x78   : > { %402 = vmatpush1.bf16.msra.mxu0 %v1048_v8  ;;  %928 = vmatpush3.bf16.msra.mxu1 %v1066_v34  ;;  %v1513_v50 = vrot.slane %v303_v48, %v307_v47  ;;  %v1515_v51 = vrot.slane %v303_v48, %v311_v49 }
  0x79   : > { %403 = vmatprep.subr.bf16.mxu0 %v1049_v9  ;;  %929 = vmatprep.subr.bf16.mxu1 %v1067_v35  ;;  %p1204_p12 = por %p1203_p9, %p1202_p5 }
  0x7b   : > { %p1205_p1 = pnand %p1204_p12, %p1198_p3 }
  0x7c   : > { %404 = vmatpush1.bf16.msra.mxu0 %v1051_v10  ;;  %930 = vmatpush3.bf16.msra.mxu1 %v1068_v36 }
  0x7d   : > { %405 = vmatprep.subr.bf16.mxu0 %v1052_v11  ;;  %931 = vmatprep.subr.bf16.mxu1 %v1069_v37 }
  0x80   : > { %406 = vmatpush1.bf16.msra.mxu0 %v1054_v15  ;;  %932 = vmatpush3.bf16.msra.mxu1 %v1070_v38 }
  0x81   : > { %407 = vmatprep.subr.bf16.mxu0 %v1055_v17  ;;  %933 = vmatprep.subr.bf16.mxu1 %v1071_v39 }
  0x84   : > { %408 = vmatpush1.bf16.msra.mxu0 %v1057_v18  ;;  %934 = vmatpush3.bf16.msra.mxu1 %v1072_v40 }
  0x85   : > { %409 = vmatprep.subr.bf16.mxu0 %v1058_v19  ;;  %935 = vmatprep.subr.bf16.mxu1 %v1073_v41 }
  0x88   : > { %410 = vmatpush1.bf16.msra.mxu0 %v1060_v20  ;;  %936 = vmatpush3.bf16.msra.mxu1 %v1074_v42 }
  0x89   : > { %937 = vmatprep.subr.bf16.mxu1 %v1075_v43 }
  0x8b   : > { %428 = vmatmul.mubr.bf16.vlgmr.msra.gmra.mrb[0].mxu0 %v283_v23 }
  0x8c   : > { %437 = vmatprep.mubr.bf16.mxu0 %v1274_v0  ;;  %938 = vmatpush3.bf16.msra.mxu1 %v1076_v44 }
  0x93   : > { %438 = vmatmul.mubr.bf16.gmra.mrb[4].mxu0 %v284_v26 }
  0x94   : > { %447 = vmatprep.mubr.bf16.mxu0 %v1274_v0 }
  0x9b   : > { %448 = vmatmul.mubr.bf16.gmra.mrb[8].mxu0 %v285_v29 }
  0x9c   : > { %457 = vmatprep.mubr.bf16.mxu0 %v1274_v0 }
  0xa3   : > { %458 = vmatmul.mubr.bf16.gmra.mrb[12].mxu0 %v286_v32 }
 0x15e   : > { %v429_v52 = vpop.f32.mrb[0].mxu0 }
 0x15f   : > { %v430_v53 = vadd.f32 %v429_v52, %v1513_v50  ;;  %v431_v54 = vpop.f32.mrb[1].mxu0 }
 0x160   : > { %v432_v55 = vadd.f32 %v431_v54, %v1515_v51  ;;  %v433_v56 = vpop.f32.mrb[2].mxu0 }
 0x161   : > { %v484_v57 = vmul.f32 0.70710677, %v430_v53  ;;  %v434_v58 = vadd.f32 %v433_v56, %v1513_v50  ;;  %v435_v59 = vpop.f32.mrb[3].mxu0  ;;  %v468_v16 = vmul.f32 0.5, %v430_v53 }
 0x162   : > { %v485_v60 = vmul.f32 0.70710677, %v432_v55  ;;  %v436_v61 = vadd.f32 %v435_v59, %v1515_v51  ;;  %v469_v26 = vmul.f32 0.5, %v432_v55 }
 0x163   : > { %1077 = verf.f32 %v484_v57  ;;  %v486_v62 = vmul.f32 0.70710677, %v434_v58  ;;  %v470_v21 = vmul.f32 0.5, %v434_v58 }
 0x164   : > { %1079 = verf.f32 %v485_v60  ;;  %v487_v63 = vmul.f32 0.70710677, %v436_v61  ;;  %v471_v32 = vmul.f32 0.5, %v436_v61 }
 0x165   : > { %1081 = verf.f32 %v486_v62 }
 0x166   : > { %1083 = verf.f32 %v487_v63  ;;  %v439_v0 = vpop.f32.mrb[4].mxu0 }
 0x167   : > { %v440_v1 = vadd.f32 %v439_v0, %v1513_v50  ;;  %v441_v2 = vpop.f32.mrb[5].mxu0 }
 0x168   : > { %v442_v3 = vadd.f32 %v441_v2, %v1515_v51  ;;  %v443_v4 = vpop.f32.mrb[6].mxu0 }
 0x169   : > { %v488_v5 = vmul.f32 0.70710677, %v440_v1  ;;  %v444_v6 = vadd.f32 %v443_v4, %v1513_v50  ;;  %v445_v7 = vpop.f32.mrb[7].mxu0  ;;  %v472_v53 = vmul.f32 0.5, %v440_v1 }
 0x16a   : > { %v489_v8 = vmul.f32 0.70710677, %v442_v3  ;;  %v446_v9 = vadd.f32 %v445_v7, %v1515_v51  ;;  %v473_v58 = vmul.f32 0.5, %v442_v3 }
 0x16b   : > { %1085 = verf.f32 %v488_v5  ;;  %v490_v10 = vmul.f32 0.70710677, %v444_v6  ;;  %v474_v54 = vmul.f32 0.5, %v444_v6 }
 0x16c   : > { %1087 = verf.f32 %v489_v8  ;;  %v491_v11 = vmul.f32 0.70710677, %v446_v9  ;;  %v475_v59 = vmul.f32 0.5, %v446_v9 }
 0x16d   : > { %v1078_v12 = vpop.eup %1077  ;;  %1089 = verf.f32 %v490_v10 }
 0x16e   : > { %v1080_v13 = vpop.eup %1079  ;;  %1091 = verf.f32 %v491_v11  ;;  %v449_v14 = vpop.f32.mrb[8].mxu0  ;;  %v516_v17 = vadd.f32 1.0, %v1078_v12 }
 0x16f   : > { %v1082_v15 = vpop.eup %1081  ;;  %v1526_v18 = vadd.f32 %v449_v14, %v1513_v50  ;;  %v451_v19 = vpop.f32.mrb[9].mxu0  ;;  %v517_v25 = vadd.f32 1.0, %v1080_v13 }
 0x170   : > { %v1084_v20 = vpop.eup %1083  ;;  %v518_v22 = vadd.f32 1.0, %v1082_v15  ;;  %v1529_v23 = vadd.f32 %v451_v19, %v1515_v51  ;;  %v453_v24 = vpop.f32.mrb[10].mxu0  ;;  %v532_v35 = vmul.f32 %v516_v17, %v468_v16 }
 0x171   : > { %v492_v27 = vmul.f32 0.70710677, %v1526_v18  ;;  %v454_v28 = vadd.f32 %v453_v24, %v1513_v50  ;;  %v455_v29 = vpop.f32.mrb[11].mxu0  ;;  %v519_v30 = vadd.f32 1.0, %v1084_v20  ;;  %v533_v38 = vmul.f32 %v517_v25, %v469_v26 }
 0x172   : > { %v534_v31 = vmul.f32 %v518_v22, %v470_v21  ;;  %v493_v33 = vmul.f32 0.70710677, %v1529_v23  ;;  %v456_v34 = vadd.f32 %v455_v29, %v1515_v51 }
 0x173   : > { %1093 = verf.f32 %v492_v27  ;;  %v494_v36 = vmul.f32 0.70710677, %v454_v28  ;;  %v535_v39 = vmul.f32 %v519_v30, %v471_v32  ;;  %v478_v16 = vmul.f32 0.5, %v454_v28 }
 0x174   : > { %1095 = verf.f32 %v493_v33  ;;  %v495_v37 = vmul.f32 0.70710677, %v456_v34  ;;  %v548_v41 = vpack.c.bf16 %v534_v31, %v532_v35  ;;  %v479_v19 = vmul.f32 0.5, %v456_v34 }
 0x175   : > { %v1086_v40 = vpop.eup %1085  ;;  %1097 = verf.f32 %v494_v36  ;;  %v549_v45 = vpack.c.bf16 %v535_v39, %v533_v38 }
 0x176   : > { %v1088_v42 = vpop.eup %1087  ;;  %v520_v43 = vadd.f32 1.0, %v1086_v40  ;;  %1099 = verf.f32 %v495_v37  ;;  %v459_v44 = vpop.f32.mrb[12].mxu0 }
 0x177   : > { %v1090_v46 = vpop.eup %1089  ;;  %v521_v47 = vadd.f32 1.0, %v1088_v42  ;;  %v460_v48 = vadd.f32 %v459_v44, %v1513_v50  ;;  %v461_v49 = vpop.f32.mrb[13].mxu0  ;;  %723 = vmatprep.mubr.bf16.mxu1 %v549_v45  ;;  %v899_v45 = vld [vmem:[%s1611_s4] ss:$0 sm:$0xff] }
 0x178   : > { %v1092_v52 = vpop.eup %1091  ;;  %v522_v55 = vadd.f32 1.0, %v1090_v46  ;;  %v462_v56 = vadd.f32 %v461_v49, %v1515_v51  ;;  %v463_v57 = vpop.f32.mrb[14].mxu0  ;;  %724 = vmatmul.mubr.bf16.vlgmr.msra.gmra.mrb[0].mxu1 %v548_v41  ;;  %v536_v63 = vmul.f32 %v520_v43, %v472_v53 }
 0x179   : > { %v523_v60 = vadd.f32 1.0, %v1092_v52  ;;  %v496_v61 = vmul.f32 0.70710677, %v460_v48  ;;  %v465_v62 = vpop.f32.mrb[15].mxu0  ;;  %v464_v4 = vadd.f32 %v463_v57, %v1513_v50  ;;  %v537_v5 = vmul.f32 %v521_v47, %v473_v58 }
 0x17a   : > { %v538_v0 = vmul.f32 %v522_v55, %v474_v54  ;;  %v497_v2 = vmul.f32 0.70710677, %v462_v56  ;;  %v466_v1 = vadd.f32 %v465_v62, %v1515_v51  ;;  %v476_v50 = vmul.f32 0.5, %v1526_v18 }
 0x17b   : > { %v539_v7 = vmul.f32 %v523_v60, %v475_v59  ;;  %1101 = verf.f32 %v496_v61  ;;  %v498_v6 = vmul.f32 0.70710677, %v464_v4  ;;  %v477_v51 = vmul.f32 0.5, %v1529_v23 }
 0x17c   : > { %1103 = verf.f32 %v497_v2  ;;  %v550_v8 = vpack.c.bf16 %v538_v0, %v536_v63  ;;  %v499_v3 = vmul.f32 0.70710677, %v466_v1  ;;  %v480_v28 = vmul.f32 0.5, %v460_v48 }
 0x17d   : > { %v1094_v10 = vpop.eup %1093  ;;  %v551_v9 = vpack.c.bf16 %v539_v7, %v537_v5  ;;  %1105 = verf.f32 %v498_v6  ;;  %v482_v35 = vmul.f32 0.5, %v464_v4  ;;  %v481_v23 = vmul.f32 0.5, %v462_v56 }
 0x17e   : > { %v1096_v11 = vpop.eup %1095  ;;  %v524_v12 = vadd.f32 1.0, %v1094_v10  ;;  %1107 = verf.f32 %v499_v3  ;;  %v483_v34 = vmul.f32 0.5, %v466_v1 }
 0x17f   : > { %v1098_v13 = vpop.eup %1097  ;;  %v525_v14 = vadd.f32 1.0, %v1096_v11  ;;  %731 = vmatprep.mubr.bf16.mxu1 %v551_v9 }
 0x180   : > { %v1100_v15 = vpop.eup %1099  ;;  %v526_v17 = vadd.f32 1.0, %v1098_v13  ;;  %732 = vmatmul.mubr.bf16.gmra.mrb[4].mxu1 %v550_v8  ;;  %v540_v21 = vmul.f32 %v524_v12, %v476_v50 }
 0x181   : > { %v527_v20 = vadd.f32 1.0, %v1100_v15  ;;  %v541_v24 = vmul.f32 %v525_v14, %v477_v51 }
 0x182   : > { %v542_v22 = vmul.f32 %v526_v17, %v478_v16 }
 0x183   : > { %v543_v25 = vmul.f32 %v527_v20, %v479_v19 }
 0x184   : > { %v552_v26 = vpack.c.bf16 %v542_v22, %v540_v21 }
 0x185   : > { %v1102_v27 = vpop.eup %1101  ;;  %v553_v29 = vpack.c.bf16 %v543_v25, %v541_v24 }
 0x186   : > { %v1104_v30 = vpop.eup %1103  ;;  %v528_v31 = vadd.f32 1.0, %v1102_v27 }
 0x187   : > { %739 = vmatprep.mubr.bf16.mxu1 %v553_v29  ;;  %v1106_v32 = vpop.eup %1105  ;;  %v529_v33 = vadd.f32 1.0, %v1104_v30 }
 0x188   : > { %v1108_v18 = vpop.eup %1107  ;;  %v530_v36 = vadd.f32 1.0, %v1106_v32  ;;  %740 = vmatmul.mubr.bf16.gmra.mrb[8].mxu1 %v552_v26  ;;  %v544_v38 = vmul.f32 %v528_v31, %v480_v28 }
 0x189   : > { %v531_v37 = vadd.f32 1.0, %v1108_v18  ;;  %v545_v40 = vmul.f32 %v529_v33, %v481_v23 }
 0x18a   : > { %v546_v39 = vmul.f32 %v530_v36, %v482_v35 }
 0x18b   : > { %v547_v41 = vmul.f32 %v531_v37, %v483_v34 }
 0x18c   : > { %v554_v42 = vpack.c.bf16 %v546_v39, %v544_v38 }
 0x18d   : > { %v555_v43 = vpack.c.bf16 %v547_v41, %v545_v40 }
 0x18f   : > { %747 = vmatprep.mubr.bf16.mxu1 %v555_v43 }
 0x190   : > { %748 = vmatmul.mubr.bf16.gmra.mrb[12].mxu1 %v554_v42 }
 0x24b   : > { %v939_v44 = vpop.f32.mrb[0].mxu1 }
 0x24c   : > { %v940_v46 = vpop.f32.mrb[1].mxu1 }
 0x24d   : > { %v941_v47 = vadd.f32 %v940_v46, %v939_v44  ;;  %v942_v48 = vpop.f32.mrb[2].mxu1 }
 0x24e   : > { %v943_v49 = vpop.f32.mrb[3].mxu1 }
 0x24f   : > { %v726_v52 = vadd.f32 %v941_v47, %v899_v45  ;;  %v944_v53 = vadd.f32 %v943_v49, %v942_v48 }
 0x251   : > { %756 = vst [vmem:[%s1546_s28] sm:$0xff] %v726_v52  ;;  %v729_v54 = vadd.f32 %v944_v53, %v899_v45 }
 0x253   : > { %757 = vst [vmem:[%s1546_s28 + $0x8] sm:$0xff] %v729_v54  ;;  %v945_v55 = vpop.f32.mrb[4].mxu1 }
 0x254   : > { %v946_v56 = vpop.f32.mrb[5].mxu1 }
 0x255   : > { %v947_v57 = vadd.f32 %v946_v56, %v945_v55  ;;  %v948_v58 = vpop.f32.mrb[6].mxu1 }
 0x256   : > { %v949_v59 = vpop.f32.mrb[7].mxu1 }
 0x257   : > { %v734_v60 = vadd.f32 %v947_v57, %v899_v45  ;;  %v950_v61 = vadd.f32 %v949_v59, %v948_v58 }
 0x259   : > { %758 = vst [vmem:[%s1546_s28 + $0x10] sm:$0xff] %v734_v60  ;;  %v737_v62 = vadd.f32 %v950_v61, %v899_v45 }
 0x25b   : > { %759 = vst [vmem:[%s1546_s28 + $0x18] sm:$0xff] %v737_v62  ;;  %v951_v63 = vpop.f32.mrb[8].mxu1 }
 0x25c   : > { %v952_v0 = vpop.f32.mrb[9].mxu1 }
 0x25d   : > { %v953_v2 = vadd.f32 %v952_v0, %v951_v63  ;;  %v954_v4 = vpop.f32.mrb[10].mxu1 }
 0x25e   : > { %v955_v5 = vpop.f32.mrb[11].mxu1 }
 0x25f   : > { %v742_v7 = vadd.f32 %v953_v2, %v899_v45  ;;  %v956_v1 = vadd.f32 %v955_v5, %v954_v4 }
 0x261   : > { %760 = vst [vmem:[%s1546_s28 + $0x20] sm:$0xff] %v742_v7  ;;  %v745_v6 = vadd.f32 %v956_v1, %v899_v45 }
 0x263   : > { %761 = vst [vmem:[%s1546_s28 + $0x28] sm:$0xff] %v745_v6  ;;  %v957_v8 = vpop.f32.mrb[12].mxu1 }
 0x264   : > { %v958_v10 = vpop.f32.mrb[13].mxu1 }
 0x265   : > { %v959_v3 = vadd.f32 %v958_v10, %v957_v8  ;;  %v960_v9 = vpop.f32.mrb[14].mxu1 }
 0x266   : > { %v961_v11 = vpop.f32.mrb[15].mxu1 }
 0x267   : > { %v750_v12 = vadd.f32 %v959_v3, %v899_v45  ;;  %v962_v13 = vadd.f32 %v961_v11, %v960_v9 }
 0x269   : > { %762 = vst [vmem:[%s1546_s28 + $0x30] sm:$0xff] %v750_v12  ;;  %v753_v14 = vadd.f32 %v962_v13, %v899_v45 }
 0x26b   : > { %763 = vst [vmem:[%s1546_s28 + $0x38] sm:$0xff] %v753_v14 }
 0x26c   : > { %1208 = shalt.err (!%p1205_p1)
}
 0x26d   : > { %s1209_s14 = scalar_lea.hbm %s1561_s12, 1024  ;;  %s1213_s15 = scalar_lea.hbm %s1612_s5, 2048 }
 0x26e   : > { %p1210_p13 = scmp.ne.s32.totalorder %s1561_s12, %s1209_s14  ;;  %p1214_p4 = scmp.lt.u32.totalorder %s1561_s12, %s1612_s5 }
 0x26f   : > { %p1215_p7 = scmp.lt.u32.totalorder %s1213_s15, %s1209_s14  ;;  %p1217_p11 = scmp.lt.u32.totalorder %s1209_s14, %s1561_s12 }
 0x270   : > { %p1211_p6 = pnand %p1210_p13, %p1626_p0 }
 0x271   : > { %p1216_p8 = por %p1215_p7, %p1214_p4 }
 0x272   : > { %p1212_p10 = pneg %p1211_p6 }
 0x273   : > { %p1218_p2 = por %p1217_p11, %p1216_p8 }
 0x275   : > { %p1219_p3 = pnand %p1218_p2, %p1212_p10 }
 0x277   : > { %1222 = shalt.err (!%p1219_p3)
}
 0x278   : > { %s1276_s17 = smov 128   ;;  %s1277_s11 = smov 8  }
 0x279   : > { %973 = dma.vmem_to_hbm [thread:$0]  (%p1626_p0), %s1556_s13, 1024, %s1561_s12, %s765_s30, %s1276_s17, %s1276_s17, %s1277_s11  }
 0x27a PF: > { %s793_s29 = sand.u32 1, %s1253_s18   ;;  %p1627_p5 = scmp.ne.s32.totalorder %s1617_s25, 0 }
 0x27b   : > { %p1628_p9 = scmp.ge.s32.totalorder %s1265_s21, 2  ;;  %s794_s9 = scalar_lea.sflag [#allocation4], %s793_s29 }
 0x27d   : > { %p987_p12 = pnand %p1628_p9, %p1627_p5 }
 0x27f   : > { %1248 = dma.done.wait (!%p987_p12), %s794_s9, 1024  }
 0x280   : > { %1250 = vsyncadd (!%p987_p12), %s794_s9, 4294966272  ;;  %p19_p1 = scmp.ge.s32.totalorder %s1421_s23, 4   ;;  %s1629_s18 = smov %s1257_s19 }
 0x281   : > { %s1630_s19 = smov %s1261_s20  ;;  %s1631_s20 = smov %s1430_s7 }
 0x282   : > { %s1632_s21 = smov %s1421_s23  ;;  %21 = sbr.rel (!%p19_p1) target bundleno = 6 (0x6), region = 93 }
 0x289   :  { %799 = vsyncpa [#allocation3], 1 }
 0x28a   :  { %801 = vsyncpa [#allocation3 + $0x1], 1 }
 0x28b   :  { %802 = vsyncpa [#allocation6], 1 }
 0x28c   :  { %803 = vsyncpa [#allocation4], 1 }
 0x28d   :  { %805 = vsyncpa [#allocation4 + $0x1], 1 }

</bundles_post_ra>
